<compile_context>
chip_gen: v7x
topology: tpu7x:2x2x1
jax: 0.10.0
libtpu: 0.0.40
codegen_flags: <defaults>
</compile_context>

<pallas_src>
import jax
import jax.numpy as jnp
from jax.experimental import pallas as pl
from jax.experimental.pallas import tpu as pltpu


def _copy_kernel(x_ref, o_ref):
    # Lane-dense identity copy of one (TB, TF) tile.
    o_ref[...] = x_ref[...]


def _sublane_tile(itemsize: int) -> int:
    # Packed sub-32-bit dtypes need more rows per vreg to stay dense.
    return {1: 32, 2: 16, 4: 8}.get(itemsize, 8)


def _vmem_capacity_bytes() -> int:
    try:
        return int(pltpu.get_tpu_info().vmem_capacity_bytes)
    except Exception:
        return 64 * 1024 * 1024  # conservative default: v7x per-TC VMEM


def _choose_slab_and_tiles(n: int, flat: int, itemsize: int):
    """Pick a dense 2D slab (rows, W) re-factoring n*flat, and its (TB, TF) tile."""
    total = n * flat
    sub = _sublane_tile(itemsize)
    cap = _vmem_capacity_bytes()
    # ~8 MiB blocks on 128 MiB VMEM parts (v5e/v6e), ~4 MiB on v7x (64 MiB).
    block_budget = max(512 * 1024, cap // 16)

    rows, w = None, None
    if total % 128 == 0:
        # Largest multiple of 128 (<= 2048) dividing total such that
        # rows = total // W is at least one sublane tile; else the largest one.
        best_any = None
        upper = min(2048, total)
        for cand in range(upper - upper % 128, 0, -128):
            if total % cand == 0:
                if best_any is None:
                    best_any = cand
                if total // cand >= sub:
                    w = cand
                    break
        if w is None:
            w = best_any
        if w is not None:
            rows = total // w

    if w is None:
        # total not a multiple of 128: keep the logical (n, flat) layout and use
        # full-extent blocks on the last dim (legal exception to the 128 rule).
        rows, w = n, flat

    # Row tile: as large as the block budget allows, rounded to the sublane tile.
    row_bytes = max(w * itemsize, 1)
    tb_cap = max(sub, (block_budget // row_bytes) // sub * sub)
    if rows <= tb_cap:
        # Whole row extent fits in one block.  If the copy is big enough that
        # DMA time dominates per-step overhead (~0.35 us), split rows so both
        # v7x TensorCores get DMA work.
        if rows >= 2 * sub and total * itemsize >= (2 << 20):
            half = (rows + 1) // 2
            tb = ((half + sub - 1) // sub) * sub
        else:
            tb = rows  # full-extent block: always a legal block shape
    else:
        tb = tb_cap

    return (rows, w), (tb, w)


def flatten(x: jax.Array, *, use_kernel: bool = True) -> jax.Array:
    """y = x.reshape(x.shape[0], -1).

    With use_kernel=False this is the free metadata reshape (recommended in
    real pipelines).  With use_kernel=True the data movement is done by a
    Pallas lane-dense identity copy whose output aliases its input.
    """
    n = x.shape[0]
    flat = 1
    for d in x.shape[1:]:
        flat *= d

    if not use_kernel or n == 0 or flat == 0:
        return x.reshape(n, flat)

    itemsize = jnp.dtype(x.dtype).itemsize
    (rows, w), (tb, tf) = _choose_slab_and_tiles(n, flat, itemsize)

    # Zero-cost metadata reshape of the contiguous buffer into the dense slab.
    x2 = x.reshape(rows, w)

    grid = (pl.cdiv(rows, tb), pl.cdiv(w, tf))
    spec = pl.BlockSpec((tb, tf), lambda i, j: (i, j))

    block_bytes = tb * tf * itemsize
    cap = _vmem_capacity_bytes()
    # in+out, double-buffered = 4x block; keep explicit headroom, never exceed HW.
    vmem_limit = int(min(cap, max(32 * 1024 * 1024, 4 * block_bytes + (2 << 20))))

    out = pl.pallas_call(
        _copy_kernel,
        out_shape=jax.ShapeDtypeStruct((rows, w), x.dtype),
        grid_spec=pltpu.PrefetchScalarGridSpec(
            num_scalar_prefetch=0,
            grid=grid,
            in_specs=[spec],
            out_specs=spec,
        ),
        compiler_params=pltpu.CompilerParams(
            dimension_semantics=("parallel", "parallel"),
            vmem_limit_bytes=vmem_limit,
        ),
        cost_estimate=pl.CostEstimate(
            flops=0,
            transcendentals=0,
            bytes_accessed=2 * rows * w * itemsize,
        ),
        # Identity copy: let the output reuse the input buffer (no second HBM
        # allocation when the call sits inside a jit).
        input_output_aliases={0: 0},
    )(x2)

    # Zero-cost metadata reshape back to the logical flattened shape.
    return out.reshape(n, flat)


if __name__ == "__main__":
    key = jax.random.PRNGKey(0)
    # small NCHW input: batch=2, channels=4, spatial=16x16
    x = jax.random.normal(key, (2, 4, 16, 16), dtype=jnp.float32)

    y = flatten(x)
    y = jax.block_until_ready(y)

    # reference check against plain JAX reshape (same semantics as torch .view)
    y_ref = x.reshape(x.shape[0], -1)
    assert y.shape == (2, 4 * 16 * 16), y.shape
    assert jnp.array_equal(y, y_ref), "mismatch vs reference flatten"

    print("KERNEL_OK")
</pallas_src>

<mosaic_0001>
module attributes {stable_mosaic.version = 11 : i64} {
  func.func @_copy_kernel(%arg0: i32, %arg1: i32, %arg2: memref<8x256xf32, #tpu.memory_space<vmem>>, %arg3: memref<8x256xf32, #tpu.memory_space<vmem>>) attributes {dimension_semantics = [#tpu.dimension_semantics<parallel>, #tpu.dimension_semantics<parallel>], iteration_bounds = array<i64: 1, 1>, scalar_prefetch = 0 : i64, scratch_operands = 0 : i64, tpu.core_type = #tpu.core_type<tc>, window_params = [{transform_indices = @transform_0, window_bounds = array<i64: 8, 256>}, {transform_indices = @transform_1, window_bounds = array<i64: 8, 256>}]} {
    %c0 = arith.constant 0 : index
    %c0_0 = arith.constant 0 : index
    %0 = vector.load %arg2[%c0, %c0_0] : memref<8x256xf32, #tpu.memory_space<vmem>>, vector<8x256xf32>
    %c0_1 = arith.constant 0 : index
    %c0_2 = arith.constant 0 : index
    %1 = vector.load %arg3[%c0_1, %c0_2] : memref<8x256xf32, #tpu.memory_space<vmem>>, vector<8x256xf32>
    tpu.vector_store %arg3[%c0_1, %c0_2], %0 {strides = array<i32>} : memref<8x256xf32, #tpu.memory_space<vmem>>, vector<8x256xf32>,
    return
  }
  func.func @transform_0(%arg0: i32, %arg1: i32) -> (i32, i32) {
    %c0_i32 = arith.constant 0 : i32
    return %arg0, %arg1 : i32, i32
  }
  func.func @transform_1(%arg0: i32, %arg1: i32) -> (i32, i32) {
    %c0_i32 = arith.constant 0 : i32
    return %arg0, %arg1 : i32, i32
  }
}

</mosaic_0001>

<bundles_post_ra>
// kernel: tpu_custom_call.1
= control target key start
LH: loop header
LB: loop body
LE: loop exit
PB: predicated region body
PF: predicated region fallthrough
CT: control target
= control target key end

     0   :  { %6 = vsyncpa [#allocation3], 0  ;;  %s126_s0 = inlined_call_operand.hbm [shape: f32[8,256], index: 0, kind: input, shape index: {}, may-alias: {0,1}]   ;;  %s127_s1 = inlined_call_operand.hbm [shape: f32[8,256], index: 1, kind: output, shape index: {}, may-alias: {0,1}]  }
   0x1   :  { %7 = vsyncpa [#allocation4], 0  ;;  %s90_s6 = smov [#allocation2]   ;;  %s42_s10 = scalar_lea.hbm %s126_s0, 256 }
   0x2   :  { %s14_s7 = sshll.u32 %s90_s6, 4  ;;  %p43_p0 = scmp.ne.s32.totalorder %s126_s0, %s42_s10  ;;  %s15_s7 = int_to_ptr.vmem [resolvable:$true] %s14_s7 }
   0x3   :  { %p46_p1 = scmp.lt.u32.totalorder %s42_s10, %s126_s0 }
   0x5   :  { %p48_p2 = pnand %p46_p1, %p43_p0 }
   0x7   :  { %51 = shalt.err (!%p48_p2)
}
   0x8   :  { %s52_s15 = scalar_lea.vmem %s15_s7, 256  ;;  %p57_p4 = scmp.lt.s32.totalorder %s15_s7, %s15_s7 }
   0x9   :  { %p53_p3 = scmp.ne.s32.totalorder %s15_s7, %s52_s15  ;;  %p58_p5 = scmp.lt.s32.totalorder %s52_s15, %s52_s15 }
   0xb   :  { %p59_p6 = por %p58_p5, %p57_p4 }
   0xd   :  { %p60_p7 = pnand %p59_p6, %p53_p3 }
   0xf   :  { %63 = shalt.err (!%p60_p7)
}
  0x10   :  { %17 = dma.hbm_to_vmem [thread:$0]  %s126_s0, 256, %s15_s7, [#allocation3]  }
  0x11   :  { %86 = dma.done.wait [#allocation3], 256  }
  0x12   :  { %87 = vsyncadd [#allocation3], 4294967040  ;;  %s91_s18 = smov [#allocation5]   ;;  %v21_v0 = vld [vmem:[#allocation2] sm:$0xff]  ;;  %v22_v1 = vld [vmem:[#allocation2 + $0x8] sm:$0xff] }
  0x13   :  { %s31_s19 = sshll.u32 %s91_s18, 4  ;;  %23 = vst [vmem:[#allocation5] sm:$0xff] %v21_v0  ;;  %24 = vst [vmem:[#allocation5 + $0x8] sm:$0xff] %v22_v1  ;;  %s32_s19 = int_to_ptr.vmem [resolvable:$true] %s31_s19 }
  0x14   :  { %s64_s20 = scalar_lea.vmem %s32_s19, 256  ;;  %p69_p9 = scmp.lt.s32.totalorder %s32_s19, %s32_s19 }
  0x15   :  { %p65_p8 = scmp.ne.s32.totalorder %s32_s19, %s64_s20  ;;  %p70_p10 = scmp.lt.s32.totalorder %s64_s20, %s64_s20 }
  0x17   :  { %p71_p11 = por %p70_p10, %p69_p9 }
  0x19   :  { %p72_p12 = pnand %p71_p11, %p65_p8 }
  0x1b   :  { %75 = shalt.err (!%p72_p12)
}
  0x1c   :  { %s76_s0 = scalar_lea.hbm %s127_s1, 256 }
  0x1d   :  { %p77_p13 = scmp.ne.s32.totalorder %s127_s1, %s76_s0  ;;  %p80_p0 = scmp.lt.u32.totalorder %s76_s0, %s127_s1 }
  0x1f   :  { %p82_p1 = pnand %p80_p0, %p77_p13 }
  0x21   :  { %85 = shalt.err (!%p82_p1)
}
  0x22   :  { %34 = dma.vmem_to_hbm [thread:$0]  %s32_s19, 256, %s127_s1, [#allocation4]  }
  0x23   :  { %88 = dma.done.wait [#allocation4], 256  }
  0x24   :  { %89 = vsyncadd [#allocation4], 4294967040 }
  0x25   :  { %38 = vsyncpa [#allocation3], 1 }
  0x26   :  { %39 = vsyncpa [#allocation4], 1 }

</bundles_post_ra>
